<compile_context>
chip_gen: v7x
topology: tpu7x:2x2x1
jax: 0.10.0
libtpu: 0.0.40
codegen_flags: <defaults>
</compile_context>

<pallas_src>
import functools

import jax
import jax.numpy as jnp
from jax.experimental import pallas as pl
from jax.experimental.pallas import tpu as pltpu


# --------------------------------------------------------------------------
# helpers
# --------------------------------------------------------------------------
def _round_up(x, m):
    return (x + m - 1) // m * m


def _pick_row_tile(ho):
    # A few row-tiles per image gives the pipeline some depth and lets v7x's second
    # TensorCore share the work, without shrinking the matmul M dimension too much.
    for t in (32, 16, 8, 4):
        if ho % t == 0 and ho // t >= 2:
            return t
    return ho


def _vmem_limit_bytes():
    # Do not request the entire physical VMEM (v7x only has 64 MiB per TensorCore);
    # leave headroom for double-buffered inputs plus the f32 accumulator.
    try:
        cap = pltpu.get_tpu_info().vmem_capacity_bytes
        return int(max(32 * 1024 * 1024, min(cap * 3 // 4, 96 * 1024 * 1024)))
    except Exception:
        return 32 * 1024 * 1024


# --------------------------------------------------------------------------
# fused AvgPool2d(2) + Conv2d(3x3, stride 1, pad 1) kernel
# --------------------------------------------------------------------------
def _pool_conv_kernel(x_ref, w_ref, b_ref, o_ref, *, tho, Wp, Wo, Cin, Cout):
    # x_ref : (Hp, 2, Wp, 2*Cin) f32  -- padded image, H split into (pooled-row, parity),
    #                                    W-parity folded into the lane dim.
    # w_ref : (3, Cin, 3*Cout)   bf16 -- w_ref[ky][ci, kx*Cout + co] = W[co, ci, ky, kx]
    # b_ref : (1, 1, Cout)       f32
    # o_ref : (1, tho, Wo, Cout) f32  -- one row-tile of one image
    i = pl.program_id(1)
    nrows = tho + 2                                   # pooled rows needed (1-row halo each side)
    r0 = pl.multiple_of(i * tho, tho)

    # ---- fused AvgPool2d(2), f32 math (v5e VPU has no bf16) --------------------------
    win = x_ref[pl.ds(r0, nrows)]                     # (nrows, 2, Wp, 2*Cin)
    s = win[:, 0, :, :] + win[:, 1, :, :]             # sum the 2 rows of each 2x2 window
    pooled = (s[:, :, :Cin] + s[:, :, Cin:2 * Cin]) * 0.25   # (nrows, Wp, Cin)

    # ---- 3x3 conv as 3 MXU matmuls; kx taps folded into the output dim ---------------
    # flatten is free: Wp % 8 == 0, lane dim unchanged; then cast operands to bf16.
    lhs_all = pooled.reshape(nrows * Wp, Cin).astype(jnp.bfloat16)
    acc = jnp.zeros((tho, Wo, Cout), jnp.float32)
    for ky in range(3):
        lhs = lhs_all[ky * Wp: ky * Wp + tho * Wp]    # (tho*Wp, Cin), sublane-tile aligned
        t = jnp.dot(lhs, w_ref[ky], preferred_element_type=jnp.float32)   # (tho*Wp, 3*Cout)
        t = t.reshape(tho, Wp, 3 * Cout)
        for kx in range(3):
            acc = acc + t[:, kx:kx + Wo, kx * Cout:(kx + 1) * Cout]
    o_ref[0] = (acc + b_ref[...]).astype(o_ref.dtype)


def mean_pool_conv_forward(x_nchw, weight, bias):
    """AvgPool2d(2) followed by Conv2d(Cin, Cout, 3, stride=1, padding=1).

    x_nchw: (N, Cin, H, W) f32 with even H, W.  weight: (Cout, Cin, 3, 3).  bias: (Cout,).
    Returns (N, Cout, H//2, W//2) f32, matching the PyTorch module.
    """
    N, Cin, H, W = x_nchw.shape
    Cout = weight.shape[0]
    assert H % 2 == 0 and W % 2 == 0, "AvgPool2d(2) needs even spatial dims"

    Ho, Wo = H // 2, W // 2
    Hp = Ho + 2                      # pooled height incl. the conv's zero halo
    Wp = _round_up(Wo + 2, 8)        # pooled width incl. halo; multiple of 8 => free flatten
    tho = _pick_row_tile(Ho)
    gh = Ho // tho

    # NCHW -> NHWC boundary glue (channels on the lane axis), left to XLA.
    x = jnp.transpose(x_nchw, (0, 2, 3, 1)).astype(jnp.float32)
    # Pad by 2 so that pooling the padded image == zero-padding the pooled image by 1
    # (pool windows stay aligned); extra zero columns on the right make Wp a multiple of 8.
    xp = jnp.pad(x, ((0, 0), (2, 2), (2, 2 * Wp - W - 2), (0, 0)))
    # Free row-major reshape: (N, 2*Hp, 2*Wp, Cin) -> (N*Hp, 2, Wp, 2*Cin).
    xr = xp.reshape(N * Hp, 2, Wp, 2 * Cin)

    # Weights: (Cout, Cin, 3, 3) -> (ky, Cin, kx*Cout), bf16 MXU operand.
    wk = jnp.transpose(weight.astype(jnp.float32), (2, 1, 3, 0)).reshape(3, Cin, 3 * Cout)
    wk = wk.astype(jnp.bfloat16)
    b2 = bias.reshape(1, 1, Cout).astype(jnp.float32)

    kernel = functools.partial(_pool_conv_kernel,
                               tho=tho, Wp=Wp, Wo=Wo, Cin=Cin, Cout=Cout)

    out_nhwc = pl.pallas_call(
        kernel,
        out_shape=jax.ShapeDtypeStruct((N, Ho, Wo, Cout), jnp.float32),
        grid_spec=pltpu.PrefetchScalarGridSpec(
            num_scalar_prefetch=0,
            grid=(N, gh),
            in_specs=[
                # Whole padded image stays resident across the row-tile axis (not re-DMA'd).
                # TODO(synk): for very large images switch to a halo'd (overlapping)
                # row-tiled input block instead of keeping the full image in VMEM.
                pl.BlockSpec((Hp, 2, Wp, 2 * Cin), lambda n, i: (n, 0, 0, 0)),
                pl.BlockSpec((3, Cin, 3 * Cout), lambda n, i: (0, 0, 0)),
                pl.BlockSpec((1, 1, Cout), lambda n, i: (0, 0, 0)),
            ],
            out_specs=pl.BlockSpec((1, tho, Wo, Cout), lambda n, i: (n, i, 0, 0)),
        ),
        compiler_params=pltpu.CompilerParams(
            dimension_semantics=("parallel", "parallel"),
            vmem_limit_bytes=_vmem_limit_bytes(),
        ),
    )(xr, wk, b2)

    return jnp.transpose(out_nhwc, (0, 3, 1, 2))      # back to NCHW


# --------------------------------------------------------------------------
# pure-JAX reference (same bf16 rounding of the MXU operands, f32 accumulation)
# --------------------------------------------------------------------------
def reference_forward(x_nchw, weight, bias):
    N, C, H, W = x_nchw.shape
    Ho, Wo = H // 2, W // 2
    pooled = x_nchw.reshape(N, C, Ho, 2, Wo, 2).mean(axis=(3, 5))
    pooled = pooled.astype(jnp.bfloat16).astype(jnp.float32)
    wf = weight.astype(jnp.bfloat16).astype(jnp.float32)
    out = jax.lax.conv_general_dilated(
        pooled, wf, window_strides=(1, 1), padding=((1, 1), (1, 1)),
        dimension_numbers=("NCHW", "OIHW", "NCHW"),
        precision=jax.lax.Precision.HIGHEST)
    return out + bias.reshape(1, -1, 1, 1)


if __name__ == "__main__":
    key = jax.random.PRNGKey(0)
    kx, kw, kb = jax.random.split(key, 3)

    N, Cin, H, W = 2, 8, 16, 16
    Cout = 16
    x = jax.random.normal(kx, (N, Cin, H, W), jnp.float32)
    w = jax.random.normal(kw, (Cout, Cin, 3, 3), jnp.float32) * (1.0 / (Cin * 9.0) ** 0.5)
    b = jax.random.normal(kb, (Cout,), jnp.float32) * 0.1

    fwd = jax.jit(mean_pool_conv_forward)
    out = fwd(x, w, b)
    jax.block_until_ready(out)

    ref = reference_forward(x, w, b)
    assert out.shape == (N, Cout, H // 2, W // 2)
    assert bool(jnp.all(jnp.isfinite(out)))
    max_err = float(jnp.max(jnp.abs(out - ref)))
    assert max_err < 5e-3, f"max abs err {max_err}"
    print("KERNEL_OK")
</pallas_src>

<mosaic_0001>
module attributes {stable_mosaic.version = 11 : i64} {
  func.func @_pool_conv_kernel(%arg0: i32, %arg1: i32, %arg2: memref<10x2x16x16xf32, #tpu.memory_space<vmem>>, %arg3: memref<3x8x48xbf16, #tpu.memory_space<vmem>>, %arg4: memref<1x1x16xf32, #tpu.memory_space<vmem>>, %arg5: memref<1x4x8x16xf32, #tpu.memory_space<vmem>>) attributes {dimension_semantics = [#tpu.dimension_semantics<parallel>, #tpu.dimension_semantics<parallel>], iteration_bounds = array<i64: 2, 2>, scalar_prefetch = 0 : i64, scratch_operands = 0 : i64, tpu.core_type = #tpu.core_type<tc>, window_params = [{transform_indices = @transform_0, window_bounds = array<i64: 10, 2, 16, 16>}, {pipeline_mode = #tpu.pipeline_mode<synchronous>, transform_indices = @transform_1, window_bounds = array<i64: 3, 8, 48>}, {pipeline_mode = #tpu.pipeline_mode<synchronous>, transform_indices = @transform_2, window_bounds = array<i64: 1, 1, 16>}, {transform_indices = @transform_3, window_bounds = array<i64: 1, 4, 8, 16>}]} {
    %c4_i32 = arith.constant 4 : i32
    %0 = arith.muli %arg1, %c4_i32 : i32
    %1 = tpu.assume_multiple %0, 4 : i32
    %2 = arith.index_cast %1 : i32 to index
    %c0 = arith.constant 0 : index
    %c0_0 = arith.constant 0 : index
    %c0_1 = arith.constant 0 : index
    %3 = vector.load %arg2[%2, %c0, %c0_0, %c0_1] : memref<10x2x16x16xf32, #tpu.memory_space<vmem>>, vector<6x2x16x16xf32>
    %4 = vector.extract_strided_slice %3 {offsets = [0, 0, 0, 0], sizes = [6, 1, 16, 16], strides = [1, 1, 1, 1]} : vector<6x2x16x16xf32> to vector<6x1x16x16xf32>
    %5 = vector.shape_cast %4 : vector<6x1x16x16xf32> to vector<6x16x16xf32>
    %6 = vector.extract_strided_slice %3 {offsets = [0, 1, 0, 0], sizes = [6, 1, 16, 16], strides = [1, 1, 1, 1]} : vector<6x2x16x16xf32> to vector<6x1x16x16xf32>
    %7 = vector.shape_cast %6 : vector<6x1x16x16xf32> to vector<6x16x16xf32>
    %8 = arith.addf %5, %7 : vector<6x16x16xf32>
    %9 = vector.extract_strided_slice %8 {offsets = [0, 0, 0], sizes = [6, 16, 8], strides = [1, 1, 1]} : vector<6x16x16xf32> to vector<6x16x8xf32>
    %10 = vector.extract_strided_slice %8 {offsets = [0, 0, 8], sizes = [6, 16, 8], strides = [1, 1, 1]} : vector<6x16x16xf32> to vector<6x16x8xf32>
    %11 = arith.addf %9, %10 : vector<6x16x8xf32>
    %cst = arith.constant 2.500000e-01 : f32
    %12 = vector.broadcast %cst : f32 to vector<6x16x8xf32>
    %13 = arith.mulf %11, %12 : vector<6x16x8xf32>
    %14 = vector.shape_cast %13 : vector<6x16x8xf32> to vector<96x8xf32>
    %15 = arith.truncf %14 : vector<96x8xf32> to vector<96x8xbf16>
    %cst_2 = arith.constant 0.000000e+00 : f32
    %16 = vector.broadcast %cst_2 : f32 to vector<4x8x16xf32>
    %17 = vector.extract_strided_slice %15 {offsets = [0, 0], sizes = [64, 8], strides = [1, 1]} : vector<96x8xbf16> to vector<64x8xbf16>
    %c0_3 = arith.constant 0 : index
    %c0_4 = arith.constant 0 : index
    %c0_5 = arith.constant 0 : index
    %18 = vector.load %arg3[%c0_3, %c0_4, %c0_5] : memref<3x8x48xbf16, #tpu.memory_space<vmem>>, vector<1x8x48xbf16>
    %19 = vector.shape_cast %18 : vector<1x8x48xbf16> to vector<8x48xbf16>
    %cst_6 = arith.constant dense<0.000000e+00> : vector<64x48xf32>
    %20 = tpu.matmul %17, %19, %cst_6 {dimension_numbers = #tpu.dot_dimension_numbers<[1], [0], [0], [1], [0, 0, 1, 1], [], []>} : vector<64x8xbf16>, vector<8x48xbf16>, vector<64x48xf32> -> vector<64x48xf32>
    %21 = vector.shape_cast %20 : vector<64x48xf32> to vector<4x16x48xf32>
    %22 = vector.extract_strided_slice %21 {offsets = [0, 0, 0], sizes = [4, 8, 16], strides = [1, 1, 1]} : vector<4x16x48xf32> to vector<4x8x16xf32>
    %23 = arith.addf %16, %22 : vector<4x8x16xf32>
    %24 = vector.extract_strided_slice %21 {offsets = [0, 1, 16], sizes = [4, 8, 16], strides = [1, 1, 1]} : vector<4x16x48xf32> to vector<4x8x16xf32>
    %25 = arith.addf %23, %24 : vector<4x8x16xf32>
    %26 = vector.extract_strided_slice %21 {offsets = [0, 2, 32], sizes = [4, 8, 16], strides = [1, 1, 1]} : vector<4x16x48xf32> to vector<4x8x16xf32>
    %27 = arith.addf %25, %26 : vector<4x8x16xf32>
    %28 = vector.extract_strided_slice %15 {offsets = [16, 0], sizes = [64, 8], strides = [1, 1]} : vector<96x8xbf16> to vector<64x8xbf16>
    %c1 = arith.constant 1 : index
    %c0_7 = arith.constant 0 : index
    %c0_8 = arith.constant 0 : index
    %29 = vector.load %arg3[%c1, %c0_7, %c0_8] : memref<3x8x48xbf16, #tpu.memory_space<vmem>>, vector<1x8x48xbf16>
    %30 = vector.shape_cast %29 : vector<1x8x48xbf16> to vector<8x48xbf16>
    %cst_9 = arith.constant dense<0.000000e+00> : vector<64x48xf32>
    %31 = tpu.matmul %28, %30, %cst_9 {dimension_numbers = #tpu.dot_dimension_numbers<[1], [0], [0], [1], [0, 0, 1, 1], [], []>} : vector<64x8xbf16>, vector<8x48xbf16>, vector<64x48xf32> -> vector<64x48xf32>
    %32 = vector.shape_cast %31 : vector<64x48xf32> to vector<4x16x48xf32>
    %33 = vector.extract_strided_slice %32 {offsets = [0, 0, 0], sizes = [4, 8, 16], strides = [1, 1, 1]} : vector<4x16x48xf32> to vector<4x8x16xf32>
    %34 = arith.addf %27, %33 : vector<4x8x16xf32>
    %35 = vector.extract_strided_slice %32 {offsets = [0, 1, 16], sizes = [4, 8, 16], strides = [1, 1, 1]} : vector<4x16x48xf32> to vector<4x8x16xf32>
    %36 = arith.addf %34, %35 : vector<4x8x16xf32>
    %37 = vector.extract_strided_slice %32 {offsets = [0, 2, 32], sizes = [4, 8, 16], strides = [1, 1, 1]} : vector<4x16x48xf32> to vector<4x8x16xf32>
    %38 = arith.addf %36, %37 : vector<4x8x16xf32>
    %39 = vector.extract_strided_slice %15 {offsets = [32, 0], sizes = [64, 8], strides = [1, 1]} : vector<96x8xbf16> to vector<64x8xbf16>
    %c2 = arith.constant 2 : index
    %c0_10 = arith.constant 0 : index
    %c0_11 = arith.constant 0 : index
    %40 = vector.load %arg3[%c2, %c0_10, %c0_11] : memref<3x8x48xbf16, #tpu.memory_space<vmem>>, vector<1x8x48xbf16>
    %41 = vector.shape_cast %40 : vector<1x8x48xbf16> to vector<8x48xbf16>
    %cst_12 = arith.constant dense<0.000000e+00> : vector<64x48xf32>
    %42 = tpu.matmul %39, %41, %cst_12 {dimension_numbers = #tpu.dot_dimension_numbers<[1], [0], [0], [1], [0, 0, 1, 1], [], []>} : vector<64x8xbf16>, vector<8x48xbf16>, vector<64x48xf32> -> vector<64x48xf32>
    %43 = vector.shape_cast %42 : vector<64x48xf32> to vector<4x16x48xf32>
    %44 = vector.extract_strided_slice %43 {offsets = [0, 0, 0], sizes = [4, 8, 16], strides = [1, 1, 1]} : vector<4x16x48xf32> to vector<4x8x16xf32>
    %45 = arith.addf %38, %44 : vector<4x8x16xf32>
    %46 = vector.extract_strided_slice %43 {offsets = [0, 1, 16], sizes = [4, 8, 16], strides = [1, 1, 1]} : vector<4x16x48xf32> to vector<4x8x16xf32>
    %47 = arith.addf %45, %46 : vector<4x8x16xf32>
    %48 = vector.extract_strided_slice %43 {offsets = [0, 2, 32], sizes = [4, 8, 16], strides = [1, 1, 1]} : vector<4x16x48xf32> to vector<4x8x16xf32>
    %49 = arith.addf %47, %48 : vector<4x8x16xf32>
    %c0_13 = arith.constant 0 : index
    %c0_14 = arith.constant 0 : index
    %c0_15 = arith.constant 0 : index
    %50 = vector.load %arg4[%c0_13, %c0_14, %c0_15] : memref<1x1x16xf32, #tpu.memory_space<vmem>>, vector<1x1x16xf32>
    %51 = vector.broadcast %50 : vector<1x1x16xf32> to vector<4x8x16xf32>
    %52 = arith.addf %49, %51 : vector<4x8x16xf32>
    %c0_16 = arith.constant 0 : index
    %c0_17 = arith.constant 0 : index
    %c0_18 = arith.constant 0 : index
    %c0_19 = arith.constant 0 : index
    %53 = vector.load %arg5[%c0_16, %c0_17, %c0_18, %c0_19] : memref<1x4x8x16xf32, #tpu.memory_space<vmem>>, vector<1x4x8x16xf32>
    %54 = vector.shape_cast %53 : vector<1x4x8x16xf32> to vector<4x8x16xf32>
    %55 = vector.shape_cast %52 : vector<4x8x16xf32> to vector<1x4x8x16xf32>
    tpu.vector_store %arg5[%c0_16, %c0_17, %c0_18, %c0_19], %55 {strides = array<i32>} : memref<1x4x8x16xf32, #tpu.memory_space<vmem>>, vector<1x4x8x16xf32>,
    return
  }
  func.func @transform_0(%arg0: i32, %arg1: i32) -> (i32, i32, i32, i32) {
    %c0_i32 = arith.constant 0 : i32
    %c0_i32_0 = arith.constant 0 : i32
    %c0_i32_1 = arith.constant 0 : i32
    %c0_i32_2 = arith.constant 0 : i32
    return %arg0, %c0_i32, %c0_i32_0, %c0_i32_1 : i32, i32, i32, i32
  }
  func.func @transform_1(%arg0: i32, %arg1: i32) -> (i32, i32, i32) {
    %c0_i32 = arith.constant 0 : i32
    %c0_i32_0 = arith.constant 0 : i32
    %c0_i32_1 = arith.constant 0 : i32
    %c0_i32_2 = arith.constant 0 : i32
    return %c0_i32, %c0_i32_0, %c0_i32_1 : i32, i32, i32
  }
  func.func @transform_2(%arg0: i32, %arg1: i32) -> (i32, i32, i32) {
    %c0_i32 = arith.constant 0 : i32
    %c0_i32_0 = arith.constant 0 : i32
    %c0_i32_1 = arith.constant 0 : i32
    %c0_i32_2 = arith.constant 0 : i32
    return %c0_i32, %c0_i32_0, %c0_i32_1 : i32, i32, i32
  }
  func.func @transform_3(%arg0: i32, %arg1: i32) -> (i32, i32, i32, i32) {
    %c0_i32 = arith.constant 0 : i32
    %c0_i32_0 = arith.constant 0 : i32
    %c0_i32_1 = arith.constant 0 : i32
    return %arg0, %arg1, %c0_i32, %c0_i32_0 : i32, i32, i32, i32
  }
}

</mosaic_0001>

<bundles_post_ra>
// kernel: mean_pool_conv_forward.1
= control target key start
LH: loop header
LB: loop body
LE: loop exit
PB: predicated region body
PF: predicated region fallthrough
CT: control target
= control target key end

     0   :  { %8 = vsyncpa [#allocation3], 0  ;;  %s1466_s0 = inlined_call_operand.vmem [shape: f32[20,2,16,16], index: 0, kind: input, shape index: {}]   ;;  %s1467_s1 = inlined_call_operand.vmem [shape: bf16[3,8,48], index: 1, kind: input, shape index: {}]   ;;  %s1468_s2 = inlined_call_operand.vmem [shape: f32[1,1,16], index: 2, kind: input, shape index: {}]   ;;  %s1469_s3 = inlined_call_operand.hbm [shape: f32[2,8,8,16], index: 3, kind: output, shape index: {}]  }
   0x1   :  { %10 = vsyncpa [#allocation3 + $0x1], 0  ;;  %s1134_s12 = smov 0   ;;  %s1136_s13 = smov 0  }
   0x2   :  { %s1138_s14 = smov 0   ;;  %s1140_s15 = smov 0  }
   0x3   :  { %s1142_s16 = smov 0   ;;  %s1144_s17 = smov 0  }
   0x4   :  { %s1146_s18 = smov 0   ;;  %s1148_s19 = smov 0  }
   0x5 LB: > { %s852_s20 = sadd.s32 4294967295, %s1106_s19   ;;  %s853_s21 = sadd.s32 4294967294, %s1106_s19   ;;  %s1106_s19 = sphi %s1148_s19, %s16_s19   ;;  %s1102_s18 = sphi %s1146_s18, %s1478_s18   ;;  %s1098_s17 = sphi %s1144_s17, %s1477_s17   ;;  %s1094_s16 = sphi %s1142_s16, %s1476_s16   ;;  %s1090_s15 = sphi %s1140_s15, %s1475_s15   ;;  %s1086_s14 = sphi %s1138_s14, %s1474_s14   ;;  %s1082_s13 = sphi %s1136_s13, %s1473_s13   ;;  %s1078_s12 = sphi %s1134_s12, %s1472_s12  }
   0x6   : > { %s25_s22 = sadd.s32 1, %s1098_s17  ;;  %s28_s23 = sadd.s32 1, %s1102_s18 }
   0x7   : > { %p26_p0 = scmp.ge.s32.totalorder %s25_s22, 2  ;;  %p115_p1 = scmp.ne.s32.totalorder %s1086_s14, %s1082_s13 }
   0x8   : > { %p116_p2 = scmp.eq.s32.totalorder %s852_s20, 3  ;;  %p121_p5 = scmp.ne.s32.totalorder %s1082_s13, %s1078_s12 }
   0x9   : > { %s1480_s22 = smov (%p26_p0, %s25_s22), 0  ;;  %s1482_s23 = smov (!%p26_p0, %s28_s23), %s1102_s18 }
   0xa   : > { %s101_s24 = ssub.s32 %s1098_s17, %s1480_s22  ;;  %p1185_p3 = por %p116_p2, %p115_p1 }
   0xb   : > { %p30_p4 = scmp.ge.s32.totalorder %s1482_s23, 2  ;;  %p122_p6 = scmp.eq.s32.totalorder %s853_s21, 3 }
   0xc   : > { %p856_p7 = scmp.ge.s32.totalorder %s1106_s19, 1  ;;  %p156_p9 = scmp.lt.s32.totalorder %s1106_s19, 5 }
   0xd   : > { %s1484_s23 = smov (%p30_p4, %s1482_s23), 0  ;;  %p1194_p8 = por %p122_p6, %p121_p5 }
   0xe   : > { %s100_s27 = ssub.s32 %s1102_s18, %s1484_s23  ;;  %s105_s28 = sadd.s32 1, %s1086_s14 }
   0xf   : > { %s102_s29 = sor.u32 %s101_s24, %s100_s27  ;;  %p157_p10 = pnand %p856_p7, %p156_p9 }
  0x10   : > { %p103_p11 = scmp.eq.s32.totalorder %s102_s29, 0  ;;  %s181_s4 = smul.u32 (!%p157_p10), 10, %s1094_s16  ;;  %v307_v0 = vld [vmem:[%s1467_s1] sm:$0xf] (!%p157_p10)  ;;  %vm321_vm0 = vcmask (!%p157_p10), 1043456   ;;  %vm308_vm1 = vcmask (!%p157_p10), 64512  }
  0x11   : > { %160 = sbr.rel (%p157_p10) target bundleno = 561 (0x231), region = 32  ;;  %s884_s5 = sshll.u32 (!%p157_p10), %s1090_s15, 7  ;;  %933 = vmatprep.subr.msk.bf16.mxu1 (!%p157_p10), %vm321_vm0, %v307_v0  ;;  %v323_v1 = vsel (!%p157_p10), %vm321_vm0, %v307_v0, 0  ;;  %932 = vmatprep.subr.msk.bf16.mxu0 (!%p157_p10), %vm321_vm0, %v307_v0  ;;  %v866_v22 = vld [vmem:[%s1467_s1 + $0x4] sm:$0xf] (!%p157_p10)  ;;  %vm402_vm2 = vcmask (!%p157_p10), 1046528  }
  0x12   : > { %s1203_s30 = scalar_select %p103_p11, %s1086_s14, %s105_s28  }
  0x13   : > { %p182_p12 = scmp.lt.s32.totalorder (!%p157_p10), %s181_s4, 19  ;;  %931 = vmatpush3.bf16.msra.mxu1 (!%p157_p10), %v323_v1  ;;  %901 = vmatpush3.bf16.msra.mxu0 (!%p157_p10), %v323_v1  ;;  %s1108_s21 = smov (!%p157_p10), 120   ;;  %v466_v25 = vsel (!%p157_p10), %vm321_vm0, %v866_v22, 0  ;;  %v871_v27 = vld [vmem:[%s1467_s1 + $0x8] sm:$0xf] (!%p157_p10)  ;;  %vm431_vm3 = vcmask (!%p157_p10), 1045504  }
  0x14   : > { %934 = vmatprep.subr.msk.bf16.mxu1 (!%p157_p10), %vm321_vm0, %v866_v22  ;;  %935 = vmatprep.subr.msk.bf16.mxu0 (!%p157_p10), %vm321_vm0, %v871_v27  ;;  %v1252_v31 = vsel (!%p157_p10), %vm321_vm0, %v871_v27, 0  ;;  %vm753_vm4 = vcmask (!%p157_p10), 130048  }
  0x18   : > { %s1486_s4 = smov (!%p182_p12, %s181_s4), 19 }
  0x19   : > { %s883_s6 = sshll.u32 %s1486_s4, 5  ;;  %s1109_s4 = smov 112  }
  0x1a   : > { %s186_s11 = scalar_lea.vmem %s1466_s0, %s883_s6  ;;  %s178_s6 = sand.u32 1, %s1082_s13  }
  0x1b   : > { %s1216_s20 = scalar_lea.vmem %s186_s11, %s884_s5  ;;  %s1110_s5 = smov 96  }
  0x1c   : > { %v205_v2 = vld [vmem:[%s1216_s20 + $0x60] sm:$0xff]  ;;  %v207_v3 = vld [vmem:[%s1216_s20 + $0x70] sm:$0xff]  ;;  %v206_v7 = vld [vmem:[%s1216_s20 + $0x68] sm:$0xff]  ;;  %s857_s7 = sshll.u32 %s178_s6, 5  ;;  %s878_s11 = sshll.u32 %s1090_s15, 2 }
  0x1d   : > { %v201_v4 = vld [vmem:[%s1216_s20 + $0x40] sm:$0xff]  ;;  %v223_v5 = vadd.f32 %v207_v3, %v205_v2  ;;  %v203_v6 = vld [vmem:[%s1216_s20 + $0x50] sm:$0xff]  ;;  %v208_v8 = vld [vmem:[%s1216_s20 + $0x78] sm:$0xff]  ;;  %s180_s10 = scalar_lea.vmem [#allocation2], %s857_s7  ;;  %s1414_s29 = scalar_lea.sflag [#allocation3], %s178_s6 }
  0x1e   : > { %v221_v9 = vadd.f32 %v203_v6, %v201_v4  ;;  %v202_v10 = vld [vmem:[%s1216_s20 + $0x48] sm:$0xff]  ;;  %v204_v11 = vld [vmem:[%s1216_s20 + $0x58] sm:$0xff]  ;;  %v224_v12 = vadd.f32 %v208_v8, %v206_v7  ;;  %v193_v16 = vld [vmem:[%s1216_s20] sm:$0xff]  ;;  %s774_s24 = sshll.u32 %s180_s10, 4  ;;  %s1408_s24 = int_to_ptr.vmem [resolvable:$true] %s774_s24 }
  0x1f   : > { %253 = vrot.lane.b32.xlu1 %v223_v5, %s1108_s21  ;;  %v222_v13 = vadd.f32 %v204_v11, %v202_v10  ;;  %v194_v14 = vld [vmem:[%s1216_s20 + $0x8] sm:$0xff]  ;;  %v196_v15 = vld [vmem:[%s1216_s20 + $0x18] sm:$0xff]  ;;  %v195_v17 = vld [vmem:[%s1216_s20 + $0x10] sm:$0xff] }
  0x20   : > { %249 = vrot.lane.b32.xlu0 %v221_v9, %s1108_s21  ;;  %v218_v18 = vadd.f32 %v196_v15, %v194_v14  ;;  %v217_v19 = vadd.f32 %v195_v17, %v193_v16  ;;  %v198_v20 = vld [vmem:[%s1216_s20 + $0x28] sm:$0xff]  ;;  %v200_v21 = vld [vmem:[%s1216_s20 + $0x38] sm:$0xff]  ;;  %v197_v23 = vld [vmem:[%s1216_s20 + $0x20] sm:$0xff] }
  0x21   : > { %v199_v24 = vld [vmem:[%s1216_s20 + $0x30] sm:$0xff]  ;;  %v220_v26 = vadd.f32 %v200_v21, %v198_v20  ;;  %v210_v29 = vld [vmem:[%s1216_s20 + $0x88] sm:$0xff]  ;;  %v212_v30 = vld [vmem:[%s1216_s20 + $0x98] sm:$0xff] }
  0x22   : > { %v219_v28 = vadd.f32 %v199_v24, %v197_v23  ;;  %v209_v32 = vld [vmem:[%s1216_s20 + $0x80] sm:$0xff]  ;;  %v211_v33 = vld [vmem:[%s1216_s20 + $0x90] sm:$0xff]  ;;  %v226_v34 = vadd.f32 %v212_v30, %v210_v29  ;;  %v214_v36 = vld [vmem:[%s1216_s20 + $0xa8] sm:$0xff] }
  0x23   : > { %255 = vrot.lane.b32.xlu1 %v224_v12, %s1108_s21  ;;  %v225_v35 = vadd.f32 %v211_v33, %v209_v32  ;;  %v216_v37 = vld [vmem:[%s1216_s20 + $0xb8] sm:$0xff]  ;;  %v213_v38 = vld [vmem:[%s1216_s20 + $0xa0] sm:$0xff]  ;;  %v215_v39 = vld [vmem:[%s1216_s20 + $0xb0] sm:$0xff]  ;;  %s879_s20 = sshll.u32 %s1094_s16, 3 }
  0x24   : > { %251 = vrot.lane.b32.xlu0 %v222_v13, %s1108_s21  ;;  %v228_v40 = vadd.f32 %v216_v37, %v214_v36  ;;  %v227_v41 = vadd.f32 %v215_v39, %v213_v38 }
  0x27   : > { %243 = vrot.lane.b32.xlu1 %v218_v18, %s1108_s21 }
  0x28   : > { %241 = vrot.lane.b32.xlu0 %v217_v19, %s1108_s21 }
  0x2b   : > { %247 = vrot.lane.b32.xlu1 %v220_v26, %s1108_s21 }
  0x2c   : > { %245 = vrot.lane.b32.xlu0 %v219_v28, %s1108_s21 }
  0x2f   : > { %259 = vrot.lane.b32.xlu1 %v226_v34, %s1108_s21 }
  0x30   : > { %257 = vrot.lane.b32.xlu0 %v225_v35, %s1108_s21 }
  0x33   : > { %263 = vrot.lane.b32.xlu1 %v228_v40, %s1108_s21 }
  0x34   : > { %261 = vrot.lane.b32.xlu0 %v227_v41, %s1108_s21  ;;  %s771_s21 = sadd.s32 %s879_s20, %s878_s11 }
  0x35   : > { %s880_s27 = sshll.u32 %s771_s21, 7 }
  0x36   : > { %s1406_s28 = scalar_lea.hbm %s1469_s3, %s880_s27 }
  0x91   : > { %v254_v42 = vpop.permute.xlu1 %253 }
  0x92   : > { %v250_v43 = vpop.permute.xlu0 %249  ;;  %v283_v44 = vadd.f32 %v254_v42, %v223_v5 }
  0x93   : > { %v281_v45 = vadd.f32 %v250_v43, %v221_v9 }
  0x94   : > { %v295_v50 = vmul.f32 0.25, %v283_v44 }
  0x95   : > { %v256_v46 = vpop.permute.xlu1 %255  ;;  %v293_v52 = vmul.f32 0.25, %v281_v45 }
  0x96   : > { %v284_v47 = vadd.f32 %v256_v46, %v224_v12  ;;  %v252_v48 = vpop.permute.xlu0 %251 }
  0x97   : > { %v282_v49 = vadd.f32 %v252_v48, %v222_v13 }
  0x98   : > { %v296_v51 = vmul.f32 0.25, %v284_v47 }
  0x99   : > { %v294_v53 = vmul.f32 0.25, %v282_v49  ;;  %v244_v54 = vpop.permute.xlu1 %243 }
  0x9a   : > { %v304_v55 = vpack.c.bf16 %v296_v51, %v295_v50  ;;  %v278_v56 = vadd.f32 %v244_v54, %v218_v18  ;;  %v242_v57 = vpop.permute.xlu0 %241 }
  0x9b   : > { %v303_v58 = vpack.c.bf16 %v294_v53, %v293_v52  ;;  %v277_v59 = vadd.f32 %v242_v57, %v217_v19 }
  0x9c   : > { %v290_v60 = vmul.f32 0.25, %v278_v56 }
  0x9d   : > { %v289_v61 = vmul.f32 0.25, %v277_v59  ;;  %906 = vmatprep.mubr.msk.bf16.mxu1 %vm308_vm1, %v303_v58  ;;  %v248_v62 = vpop.permute.xlu1 %247 }
  0x9e   : > { %907 = vmatmul.mubr.msk.bf16.vlgmr.msra.gmra.mrb[0].mxu1 %vm308_vm1, %v304_v55  ;;  %v280_v63 = vadd.f32 %v248_v62, %v220_v26  ;;  %v246_v0 = vpop.permute.xlu0 %245 }
  0x9f   : > { %v279_v1 = vadd.f32 %v246_v0, %v219_v28  ;;  %v301_v2 = vpack.c.bf16 %v290_v60, %v289_v61  ;;  %911 = vmatpush3.bf16.msra.mxu1 %v466_v25 }
  0xa0   : > { %v292_v3 = vmul.f32 0.25, %v280_v63 }
  0xa1   : > { %v291_v4 = vmul.f32 0.25, %v279_v1  ;;  %902 = vmatprep.mubr.msk.bf16.mxu0 %vm308_vm1, %v301_v2  ;;  %v260_v5 = vpop.permute.xlu1 %259 }
  0xa2   : > { %v286_v6 = vadd.f32 %v260_v5, %v226_v34  ;;  %v258_v7 = vpop.permute.xlu0 %257 }
  0xa3   : > { %v302_v8 = vpack.c.bf16 %v292_v3, %v291_v4  ;;  %v285_v9 = vadd.f32 %v258_v7, %v225_v35 }
  0xa4   : > { %v298_v10 = vmul.f32 0.25, %v286_v6 }
  0xa5   : > { %903 = vmatmul.mubr.msk.bf16.vlgmr.msra.gmra.mrb[0].mxu0 %vm308_vm1, %v302_v8  ;;  %912 = vmatprep.mubr.msk.bf16.mxu1 %vm308_vm1, %v302_v8  ;;  %v297_v11 = vmul.f32 0.25, %v285_v9  ;;  %v264_v12 = vpop.permute.xlu1 %263 }
  0xa6   : > { %913 = vmatmul.mubr.msk.bf16.vlgmr.msra.gmra.mrb[4].mxu1 %vm308_vm1, %v303_v58  ;;  %922 = vmatprep.mubr.msk.bf16.mxu0 %vm308_vm1, %v303_v58  ;;  %v262_v13 = vpop.permute.xlu0 %261  ;;  %v288_v14 = vadd.f32 %v264_v12, %v228_v40 }
  0xa7   : > { %916 = vmatprep.mubr.msk.bf16.mxu1 %vm308_vm1, %v304_v55  ;;  %921 = vmatpush3.bf16.msra.mxu0 %v1252_v31  ;;  %v287_v15 = vadd.f32 %v262_v13, %v227_v41  ;;  %v305_v16 = vpack.c.bf16 %v298_v10, %v297_v11 }
  0xa8   : > { %v300_v17 = vmul.f32 0.25, %v288_v14 }
  0xa9   : > { %v299_v18 = vmul.f32 0.25, %v287_v15 }
  0xab   : > { %v306_v19 = vpack.c.bf16 %v300_v17, %v299_v18 }
  0xad   : > { %923 = vmatmul.mubr.msk.bf16.vlgmr.msra.gmra.mrb[4].mxu0 %vm308_vm1, %v304_v55 }
  0xae   : > { %917 = vmatmul.mubr.msk.bf16.gmra.mrb[8].mxu1 %vm308_vm1, %v305_v16  ;;  %926 = vmatprep.mubr.msk.bf16.mxu0 %vm308_vm1, %v305_v16 }
  0xb5   : > { %927 = vmatmul.mubr.msk.bf16.gmra.mrb[8].mxu0 %vm308_vm1, %v306_v19 }
 0x171   : > { %v1279_v20 = vpop.f32.mrb[0].mxu1 }
 0x172   : > { %v1281_v21 = vpop.f32.mrb[1].mxu1  ;;  %v412_v23 = vrot.slane %v1279_v20, 1  ;;  %v441_v24 = vrot.slane %v1279_v20, 2 }
 0x173   : > { %v909_v22 = vpop.f32.mrb[2].mxu1  ;;  %v409_v28 = vrot.slane %v1281_v21, 1  ;;  %v438_v29 = vrot.slane %v1281_v21, 2 }
 0x174   : > { %v413_v25 = vrot.slane %v909_v22, 1  ;;  %v442_v26 = vrot.slane %v909_v22, 2  ;;  %v378_v27 = vpop.f32.mrb[3].mxu1 }
 0x175   : > { %v410_v30 = vrot.slane %v378_v27, 1  ;;  %v439_v31 = vrot.slane %v378_v27, 2 }
 0x176   : > { %v414_v32 = vsel %vm402_vm2, %v412_v23, %v413_v25  ;;  %v1289_v33 = vsel %vm431_vm3, %v441_v24, %v442_v26 }
 0x177   : > { %v411_v34 = vsel %vm402_vm2, %v409_v28, %v410_v30  ;;  %v1293_v35 = vsel %vm431_vm3, %v438_v29, %v439_v31 }
 0x178   : > { %v1295_v36 = vpop.f32.mrb[0].mxu0 }
 0x179   : > { %v406_v37 = vrot.slane %v1295_v36, 1  ;;  %v435_v38 = vrot.slane %v1295_v36, 2  ;;  %v1299_v39 = vpop.f32.mrb[1].mxu0  ;;  %v1301_v40 = vpop.f32.mrb[4].mxu1 }
 0x17a   : > { %v403_v41 = vrot.slane %v1299_v39, 1  ;;  %v432_v42 = vrot.slane %v1299_v39, 2  ;;  %v548_v43 = vrot.slane %v1301_v40, 1  ;;  %v576_v44 = vrot.slane %v1301_v40, 2  ;;  %v905_v45 = vpop.f32.mrb[2].mxu0  ;;  %v1307_v46 = vpop.f32.mrb[5].mxu1 }
 0x17b   : > { %v407_v47 = vrot.slane %v905_v45, 1  ;;  %v436_v48 = vrot.slane %v905_v45, 2  ;;  %v545_v49 = vrot.slane %v1307_v46, 1  ;;  %v573_v50 = vrot.slane %v1307_v46, 2  ;;  %v362_v51 = vpop.f32.mrb[3].mxu0  ;;  %v915_v52 = vpop.f32.mrb[6].mxu1 }
 0x17c   : > { %v404_v53 = vrot.slane %v362_v51, 1  ;;  %v433_v54 = vrot.slane %v362_v51, 2  ;;  %v549_v55 = vrot.slane %v915_v52, 1  ;;  %v577_v56 = vrot.slane %v915_v52, 2  ;;  %v505_v57 = vpop.f32.mrb[7].mxu1 }
 0x17d   : > { %v546_v58 = vrot.slane %v505_v57, 1  ;;  %v574_v59 = vrot.slane %v505_v57, 2  ;;  %v408_v60 = vsel %vm402_vm2, %v406_v37, %v407_v47  ;;  %v437_v61 = vsel %vm431_vm3, %v435_v38, %v436_v48 }
 0x17e   : > { %417 = vrot.lane.b32.xlu1 %v408_v60, %s1109_s4  ;;  %v405_v62 = vsel %vm402_vm2, %v403_v41, %v404_v53  ;;  %v434_v63 = vsel %vm431_vm3, %v432_v42, %v433_v54  ;;  %v550_v0 = vsel %vm402_vm2, %v548_v43, %v549_v55  ;;  %v578_v1 = vsel %vm431_vm3, %v576_v44, %v577_v56 }
 0x17f   : > { %415 = vrot.lane.b32.xlu0 %v405_v62, %s1109_s4  ;;  %v547_v2 = vsel %vm402_vm2, %v545_v49, %v546_v58  ;;  %v575_v3 = vsel %vm431_vm3, %v573_v50, %v574_v59 }
 0x180   : > { %v1321_v4 = vpop.f32.mrb[4].mxu0 }
 0x181   : > { %v689_v5 = vrot.slane %v1321_v4, 1  ;;  %v717_v6 = vrot.slane %v1321_v4, 2  ;;  %v1325_v7 = vpop.f32.mrb[5].mxu0  ;;  %v1327_v8 = vpop.f32.mrb[8].mxu1 }
 0x182   : > { %v686_v9 = vrot.slane %v1325_v7, 1  ;;  %v714_v10 = vrot.slane %v1325_v7, 2  ;;  %421 = vrot.lane.b32.xlu1 %v414_v32, %s1109_s4  ;;  %v925_v11 = vpop.f32.mrb[6].mxu0  ;;  %v554_v12 = vrot.slane %v1327_v8, 1  ;;  %v582_v13 = vrot.slane %v1327_v8, 2  ;;  %v1334_v14 = vpop.f32.mrb[9].mxu1 }
 0x183   : > { %v690_v15 = vrot.slane %v925_v11, 1  ;;  %v718_v16 = vrot.slane %v925_v11, 2  ;;  %v646_v17 = vpop.f32.mrb[7].mxu0  ;;  %419 = vrot.lane.b32.xlu0 %v411_v34, %s1109_s4  ;;  %v551_v18 = vrot.slane %v1334_v14, 1  ;;  %v579_v19 = vrot.slane %v1334_v14, 2  ;;  %v919_v22 = vpop.f32.mrb[10].mxu1 }
 0x184   : > { %v687_v23 = vrot.slane %v646_v17, 1  ;;  %v715_v24 = vrot.slane %v646_v17, 2  ;;  %v555_v25 = vrot.slane %v919_v22, 1  ;;  %v583_v26 = vrot.slane %v919_v22, 2  ;;  %v521_v27 = vpop.f32.mrb[11].mxu1 }
 0x185   : > { %v691_v28 = vsel %vm402_vm2, %v689_v5, %v690_v15  ;;  %v552_v29 = vrot.slane %v521_v27, 1  ;;  %v580_v30 = vrot.slane %v521_v27, 2  ;;  %v719_v31 = vsel %vm431_vm3, %v717_v6, %v718_v16 }
 0x186   : > { %446 = vrot.lane.b32.xlu1 %v437_v61, %s1110_s5  ;;  %v688_v32 = vsel %vm402_vm2, %v686_v9, %v687_v23  ;;  %v716_v34 = vsel %vm431_vm3, %v714_v10, %v715_v24  ;;  %v556_v37 = vsel %vm402_vm2, %v554_v12, %v555_v25  ;;  %v584_v38 = vsel %vm431_vm3, %v582_v13, %v583_v26 }
 0x187   : > { %444 = vrot.lane.b32.xlu0 %v434_v63, %s1110_s5  ;;  %v553_v41 = vsel %vm402_vm2, %v551_v18, %v552_v29  ;;  %v581_v42 = vsel %vm431_vm3, %v579_v19, %v580_v30 }
 0x188   : > { %v1349_v43 = vpop.f32.mrb[8].mxu0 }
 0x189   : > { %v695_v44 = vrot.slane %v1349_v43, 1  ;;  %v723_v45 = vrot.slane %v1349_v43, 2  ;;  %v1353_v47 = vpop.f32.mrb[9].mxu0 }
 0x18a   : > { %450 = vrot.lane.b32.xlu1 %v1289_v33, %s1110_s5  ;;  %v692_v48 = vrot.slane %v1353_v47, 1  ;;  %v720_v49 = vrot.slane %v1353_v47, 2  ;;  %v929_v50 = vpop.f32.mrb[10].mxu0 }
 0x18b   : > { %448 = vrot.lane.b32.xlu0 %v1293_v35, %s1110_s5  ;;  %v696_v51 = vrot.slane %v929_v50, 1  ;;  %v724_v52 = vrot.slane %v929_v50, 2  ;;  %v662_v53 = vpop.f32.mrb[11].mxu0 }
 0x18c   : > { %v693_v54 = vrot.slane %v662_v53, 1  ;;  %v721_v55 = vrot.slane %v662_v53, 2 }
 0x18d   : > { %v697_v56 = vsel %vm402_vm2, %v695_v44, %v696_v51  ;;  %v725_v57 = vsel %vm431_vm3, %v723_v45, %v724_v52 }
 0x18e   : > { %559 = vrot.lane.b32.xlu1 %v550_v0, %s1109_s4  ;;  %v694_v33 = vsel %vm402_vm2, %v692_v48, %v693_v54  ;;  %v722_v58 = vsel %vm431_vm3, %v720_v49, %v721_v55 }
 0x18f   : > { %557 = vrot.lane.b32.xlu0 %v547_v2, %s1109_s4 }
 0x192   : > { %587 = vrot.lane.b32.xlu1 %v578_v1, %s1110_s5 }
 0x193   : > { %585 = vrot.lane.b32.xlu0 %v575_v3, %s1110_s5 }
 0x196   : > { %700 = vrot.lane.b32.xlu1 %v691_v28, %s1109_s4 }
 0x197   : > { %698 = vrot.lane.b32.xlu0 %v688_v32, %s1109_s4 }
 0x19a   : > { %728 = vrot.lane.b32.xlu1 %v719_v31, %s1110_s5 }
 0x19b   : > { %726 = vrot.lane.b32.xlu0 %v716_v34, %s1110_s5 }
 0x19e   : > { %563 = vrot.lane.b32.xlu1 %v556_v37, %s1109_s4 }
 0x19f   : > { %561 = vrot.lane.b32.xlu0 %v553_v41, %s1109_s4 }
 0x1a2   : > { %591 = vrot.lane.b32.xlu1 %v584_v38, %s1110_s5 }
 0x1a3   : > { %589 = vrot.lane.b32.xlu0 %v581_v42, %s1110_s5 }
 0x1a6   : > { %704 = vrot.lane.b32.xlu1 %v697_v56, %s1109_s4 }
 0x1a7   : > { %702 = vrot.lane.b32.xlu0 %v694_v33, %s1109_s4  ;;  %s1012_s4 = scalar_lea.vmem %s1408_s24, 512 }
 0x1a8   : > { %p1013_p13 = scmp.ne.s32.totalorder %s1408_s24, %s1012_s4 }
 0x1aa   : > { %732 = vrot.lane.b32.xlu1 %v725_v57, %s1110_s5  ;;  %p1014_p0 = pnand %p1013_p13, %p1185_p3 }
 0x1ab   : > { %730 = vrot.lane.b32.xlu0 %v722_v58, %s1110_s5  ;;  %s1111_s5 = smov [#allocation2]  }
 0x1ac   : > { %p1015_p1 = pneg %p1014_p0  ;;  %s1016_s7 = sshll.u32 %s1111_s5, 4  ;;  %s1017_s7 = int_to_ptr.vmem [resolvable:$false] %s1016_s7 }
 0x1ad   : > { %s1018_s8 = scalar_lea.vmem %s1017_s7, 1024  ;;  %p1019_p2 = scmp.lt.s32.totalorder %s1408_s24, %s1017_s7 }
 0x1ae   : > { %p1020_p4 = scmp.lt.s32.totalorder %s1018_s8, %s1012_s4 }
 0x1b0   : > { %p1021_p5 = por %p1020_p4, %p1019_p2 }
 0x1b2   : > { %p1022_p6 = pnand %p1021_p5, %p1015_p1 }
 0x1f0   : > { %v418_v35 = vpop.permute.xlu1 %417 }
 0x1f1   : > { %v416_v59 = vpop.permute.xlu0 %415  ;;  %v428_v62 = vadd.f32 %v1295_v36, %v418_v35 }
 0x1f2   : > { %v427_v63 = vadd.f32 %v416_v59, %v1299_v39 }
 0x1f4   : > { %v422_v60 = vpop.permute.xlu1 %421 }
 0x1f5   : > { %v420_v61 = vpop.permute.xlu0 %419  ;;  %v430_v5 = vadd.f32 %v1279_v20, %v422_v60 }
 0x1f6   : > { %v429_v9 = vadd.f32 %v420_v61, %v1281_v21 }
 0x1f8   : > { %v447_v0 = vpop.permute.xlu1 %446 }
 0x1f9   : > { %v457_v1 = vadd.f32 %v447_v0, %v428_v62  ;;  %v445_v2 = vpop.permute.xlu0 %444 }
 0x1fa   : > { %v456_v3 = vadd.f32 %v445_v2, %v427_v63 }
 0x1fb   : > { %v534_v6 = vadd.f32 %v1301_v40, %v457_v1 }
 0x1fc   : > { %v451_v10 = vpop.permute.xlu1 %450  ;;  %v533_v11 = vadd.f32 %v1307_v46, %v456_v3 }
 0x1fd   : > { %v459_v12 = vadd.f32 %v451_v10, %v430_v5  ;;  %v449_v13 = vpop.permute.xlu0 %448 }
 0x1fe   : > { %v458_v15 = vadd.f32 %v449_v13, %v429_v9 }
 0x1ff   : > { %v536_v36 = vadd.f32 %v1327_v8, %v459_v12 }
 0x200   : > { %v560_v39 = vpop.permute.xlu1 %559  ;;  %v535_v16 = vadd.f32 %v1334_v14, %v458_v15  ;;  %v876_v14 = vld [vmem:[%s1468_s2] ss:$0 sm:$0xff] }
 0x201   : > { %v558_v17 = vpop.permute.xlu0 %557  ;;  %v570_v18 = vadd.f32 %v560_v39, %v534_v6 }
 0x202   : > { %v569_v20 = vadd.f32 %v558_v17, %v533_v11 }
 0x204   : > { %v588_v19 = vpop.permute.xlu1 %587 }
 0x205   : > { %v598_v40 = vadd.f32 %v588_v19, %v570_v18  ;;  %v586_v22 = vpop.permute.xlu0 %585 }
 0x206   : > { %v597_v21 = vadd.f32 %v586_v22, %v569_v20 }
 0x207   : > { %v675_v23 = vadd.f32 %v1321_v4, %v598_v40 }
 0x208   : > { %v701_v46 = vpop.permute.xlu1 %700  ;;  %v674_v24 = vadd.f32 %v1325_v7, %v597_v21 }
 0x209   : > { %v699_v25 = vpop.permute.xlu0 %698  ;;  %v711_v26 = vadd.f32 %v701_v46, %v675_v23 }
 0x20a   : > { %v710_v8 = vadd.f32 %v699_v25, %v674_v24 }
 0x20c   : > { %v729_v27 = vpop.permute.xlu1 %728 }
 0x20d   : > { %v739_v28 = vadd.f32 %v729_v27, %v711_v26  ;;  %v727_v29 = vpop.permute.xlu0 %726 }
 0x20e   : > { %v738_v4 = vadd.f32 %v727_v29, %v710_v8 }
 0x20f   : > { %v750_v30 = vadd.f32 %v876_v14, %v739_v28 }
 0x210   : > { %v749_v31 = vadd.f32 %v876_v14, %v738_v4  ;;  %v564_v7 = vpop.permute.xlu1 %563 }
 0x211   : > { %755 = vst.msk [vmem:[%s180_s10 + $0x8] sm:$0xff] %vm753_vm4, %v750_v30  ;;  %v562_v32 = vpop.permute.xlu0 %561  ;;  %v572_v34 = vadd.f32 %v564_v7, %v536_v36 }
 0x212   : > { %754 = vst.msk [vmem:[%s180_s10] sm:$0xff] %vm753_vm4, %v749_v31  ;;  %v571_v37 = vadd.f32 %v562_v32, %v535_v16 }
 0x214   : > { %v592_v38 = vpop.permute.xlu1 %591 }
 0x215   : > { %v600_v41 = vadd.f32 %v592_v38, %v572_v34  ;;  %v590_v42 = vpop.permute.xlu0 %589 }
 0x216   : > { %v599_v44 = vadd.f32 %v590_v42, %v571_v37 }
 0x217   : > { %v677_v45 = vadd.f32 %v1349_v43, %v600_v41 }
 0x218   : > { %v705_v48 = vpop.permute.xlu1 %704  ;;  %v676_v49 = vadd.f32 %v1353_v47, %v599_v44 }
 0x219   : > { %v703_v50 = vpop.permute.xlu0 %702  ;;  %v713_v51 = vadd.f32 %v705_v48, %v677_v45 }
 0x21a   : > { %v712_v52 = vadd.f32 %v703_v50, %v676_v49 }
 0x21c   : > { %v733_v53 = vpop.permute.xlu1 %732 }
 0x21d   : > { %v741_v54 = vadd.f32 %v733_v53, %v713_v51  ;;  %v731_v55 = vpop.permute.xlu0 %730 }
 0x21e   : > { %v740_v56 = vadd.f32 %v731_v55, %v712_v52 }
 0x21f   : > { %v752_v57 = vadd.f32 %v876_v14, %v741_v54 }
 0x220   : > { %v751_v43 = vadd.f32 %v876_v14, %v740_v56 }
 0x221   : > { %757 = vst.msk [vmem:[%s180_s10 + $0x18] sm:$0xff] %vm753_vm4, %v752_v57 }
 0x222   : > { %756 = vst.msk [vmem:[%s180_s10 + $0x10] sm:$0xff] %vm753_vm4, %v751_v43 }
 0x223   : > { %1025 = shalt.err (!%p1022_p6)
}
 0x224   : > { %s1026_s6 = scalar_lea.hbm %s1406_s28, 512  ;;  %s1030_s11 = scalar_lea.hbm %s1469_s3, 2048 }
 0x225   : > { %p1027_p7 = scmp.ne.s32.totalorder %s1406_s28, %s1026_s6  ;;  %p1031_p11 = scmp.lt.u32.totalorder %s1406_s28, %s1469_s3 }
 0x226   : > { %p1032_p12 = scmp.lt.u32.totalorder %s1030_s11, %s1026_s6  ;;  %p1034_p0 = scmp.lt.u32.totalorder %s1026_s6, %s1406_s28 }
 0x227   : > { %p1028_p9 = pnand %p1027_p7, %p1185_p3 }
 0x228   : > { %p1033_p13 = por %p1032_p12, %p1031_p11 }
 0x229   : > { %p1029_p10 = pneg %p1028_p9 }
 0x22a   : > { %p1035_p1 = por %p1034_p0, %p1033_p13 }
 0x22c   : > { %p1036_p2 = pnand %p1035_p1, %p1029_p10 }
 0x22e   : > { %1039 = shalt.err (!%p1036_p2)
}
 0x22f   : > { %s1112_s27 = smov 128   ;;  %s1113_s15 = smov 8  }
 0x230   : > { %936 = dma.vmem_to_hbm [thread:$0]  (%p1185_p3), %s1408_s24, 512, %s1406_s28, %s1414_s29, %s1112_s27, %s1112_s27, %s1113_s15  }
 0x231 PF: > { %p942_p4 = scmp.ge.s32.totalorder %s1106_s19, 2  ;;  %s789_s16 = sand.u32 1, %s1078_s12  }
 0x232   : > { %s790_s4 = scalar_lea.sflag [#allocation3], %s789_s16 }
 0x233   : > { %p939_p5 = pnand %p942_p4, %p1194_p8 }
 0x235   : > { %1073 = dma.done.wait (!%p939_p5), %s790_s4, 512  }
 0x236   : > { %1075 = vsyncadd (!%p939_p5), %s790_s4, 4294966784  ;;  %s16_s19 = sadd.s32 1, %s1106_s19   ;;  %s1472_s12 = smov %s1082_s13 }
 0x237   : > { %p13_p6 = scmp.ge.s32.totalorder %s16_s19, 6   ;;  %s1473_s13 = smov %s1086_s14 }
 0x238   : > { %s1474_s14 = smov %s1203_s30  ;;  %s1475_s15 = smov %s1098_s17 }
 0x239   : > { %s1476_s16 = smov %s1102_s18  ;;  %s1477_s17 = smov %s1480_s22 }
 0x23a   : > { %s1478_s18 = smov %s1484_s23  ;;  %15 = sbr.rel (!%p13_p6) target bundleno = 5 (0x5), region = 70 }
 0x241   :  { %795 = vsyncpa [#allocation3], 1 }
 0x242   :  { %797 = vsyncpa [#allocation3 + $0x1], 1 }

</bundles_post_ra>
